<compile_context>
chip_gen: v6e
topology: v6e:2x2x1
jax: 0.10.0
libtpu: 0.0.40
codegen_flags: <defaults>
</compile_context>

<pallas_src>
import functools

import jax
import jax.numpy as jnp
from jax.experimental import pallas as pl
from jax.experimental.pallas import tpu as pltpu


def _round_up(x, m):
    return (x + m - 1) // m * m


# ----------------------------------------------------------------------------
# Fused decoder-step kernel: embedding gather -> ReLU -> LSTM cell -> projection.
# Single grid point; every operand is a whole-array VMEM block.
# ----------------------------------------------------------------------------
def _decoder_step_kernel(tok_ref, emb_ref, h_ref, c_ref,
                         w_ref, b_ref, wout_ref, bout_ref,
                         logits_ref, hout_ref, cout_ref, xz_ref):
    Bp, Hp = h_ref.shape
    Vp, Ep = emb_ref.shape

    # ---- In-kernel embedding lookup: exact one-hot x table matmul (MXU). ----
    vocab_iota = jax.lax.broadcasted_iota(jnp.int32, (Bp, Vp), 1)
    one_hot = (vocab_iota == tok_ref[...]).astype(jnp.float32)            # (Bp, Vp)
    x = jnp.dot(one_hot, emb_ref[...],
                preferred_element_type=jnp.float32)                       # (Bp, Ep)

    # ---- ReLU(embedded) and [x | h] concatenation into one activation block. ----
    xz_ref[:, :Ep] = jnp.maximum(x, 0.0)                                  # ReLU
    xz_ref[:, Ep:] = h_ref[...]

    # ---- Fused LSTM gates: ONE bf16 MXU dot against the stacked [w_ih; w_hh]. ----
    gates = (jnp.dot(xz_ref[...].astype(jnp.bfloat16), w_ref[...],
                     preferred_element_type=jnp.float32)
             + b_ref[...])                                                # (Bp, 4*Hp) f32

    # PyTorch gate order [i, f, g, o]; each slice is a 128-lane-aligned block.
    # Elementwise gate math deliberately stays in f32 (v5e has no bf16 VPU/EUP).
    i_g = jax.nn.sigmoid(gates[:, 0 * Hp:1 * Hp])
    f_g = jax.nn.sigmoid(gates[:, 1 * Hp:2 * Hp])
    g_g = jnp.tanh(gates[:, 2 * Hp:3 * Hp])
    o_g = jax.nn.sigmoid(gates[:, 3 * Hp:4 * Hp])

    c_new = f_g * c_ref[...] + i_g * g_g
    h_new = o_g * jnp.tanh(c_new)

    # ---- Output projection (bf16 weights, f32 accumulate), lane-dense logits. ----
    logits_ref[...] = (jnp.dot(h_new.astype(jnp.bfloat16), wout_ref[...],
                               preferred_element_type=jnp.float32)
                       + bout_ref[...])                                   # (Bp, Vp)
    hout_ref[...] = h_new
    cout_ref[...] = c_new


# ----------------------------------------------------------------------------
# Parameter padding / repacking (done once, outside the per-step call).
# ----------------------------------------------------------------------------
def pad_decoder_params(params):
    """Pad & repack logical weights to TPU-friendly shapes.

    * lanes -> multiples of 128, each of the 4 LSTM gates 128-lane aligned
    * [w_ih; w_hh] stacked into one matrix so the gate matmul is a single dot
    * matmul weights stored as bfloat16 (streamed bytes halved; f32 accumulate)
    * all padded entries are exactly zero, so padding is numerically inert
    """
    V, E = params["emb"].shape
    H = params["w_hh"].shape[0]
    Ep = _round_up(E, 128)
    Hp = _round_up(H, 128)
    Vp = _round_up(V, 128)

    # Embedding table, f32 (the in-kernel one-hot gather is then exact).
    emb_p = jnp.zeros((Vp, Ep), jnp.float32).at[:V, :E].set(params["emb"])

    # Stacked LSTM weight [w_ih; w_hh] -> (Ep+Hp, 4*Hp), each gate 128-lane aligned.
    w_cat = jnp.zeros((Ep + Hp, 4 * Hp), jnp.float32)
    for k in range(4):
        w_cat = w_cat.at[:E, k * Hp:k * Hp + H].set(params["w_ih"][:, k * H:(k + 1) * H])
        w_cat = w_cat.at[Ep:Ep + H, k * Hp:k * Hp + H].set(params["w_hh"][:, k * H:(k + 1) * H])

    b = jnp.zeros((1, 4 * Hp), jnp.float32)
    for k in range(4):
        b = b.at[0, k * Hp:k * Hp + H].set(params["b"][k * H:(k + 1) * H])

    w_out = jnp.zeros((Hp, Vp), jnp.float32).at[:H, :V].set(params["w_out"])
    b_out = jnp.zeros((1, Vp), jnp.float32).at[0, :V].set(params["b_out"])

    return {
        "emb": emb_p,                          # (Vp, Ep) f32
        "w_cat": w_cat.astype(jnp.bfloat16),   # (Ep+Hp, 4*Hp) bf16
        "b": b,                                # (1, 4*Hp) f32
        "w_out": w_out.astype(jnp.bfloat16),   # (Hp, Vp) bf16
        "b_out": b_out,                        # (1, Vp) f32
    }


# ----------------------------------------------------------------------------
# Decoder forward (matches the PyTorch module's forward).
# ----------------------------------------------------------------------------
@functools.partial(jax.jit, static_argnames=("hidn_dim", "output_dim"))
def decoder_forward(padded, tokens, prev_hidden, prev_cell, *, hidn_dim, output_dim):
    """tokens: (B,) int32; prev_hidden/prev_cell: (1, B, H).
    Returns (logits (B, V), hidden (1, B, H), cell (1, B, H))."""
    B = tokens.shape[0]
    Vp, Ep = padded["emb"].shape
    Hp = padded["w_out"].shape[0]
    Bp = _round_up(B, 8)

    # Tiny glue: pad tokens / h / c to the padded (sublane, lane) layout.
    tok_p = jnp.zeros((Bp, 1), jnp.int32).at[:B, 0].set(tokens.astype(jnp.int32))
    h_p = jnp.zeros((Bp, Hp), jnp.float32).at[:B, :hidn_dim].set(prev_hidden[0])
    c_p = jnp.zeros((Bp, Hp), jnp.float32).at[:B, :hidn_dim].set(prev_cell[0])

    flops = 2 * Bp * (Vp * Ep + (Ep + Hp) * 4 * Hp + Hp * Vp)
    transcendentals = 5 * Bp * Hp  # 3 sigmoid + 2 tanh per hidden lane
    bytes_accessed = (padded["emb"].size * 4
                      + padded["w_cat"].size * 2 + padded["w_out"].size * 2
                      + (padded["b"].size + padded["b_out"].size) * 4
                      + 4 * Bp * Hp * 4          # h/c in + h/c out
                      + Bp * Vp * 4 + Bp * 4)    # logits out + tokens in

    logits_p, h_new_p, c_new_p = pl.pallas_call(
        _decoder_step_kernel,
        out_shape=(
            jax.ShapeDtypeStruct((Bp, Vp), jnp.float32),
            jax.ShapeDtypeStruct((Bp, Hp), jnp.float32),
            jax.ShapeDtypeStruct((Bp, Hp), jnp.float32),
        ),
        scratch_shapes=[pltpu.VMEM((Bp, Ep + Hp), jnp.float32)],  # [x | h] activation
        # Alias the padded h/c state buffers in place (inputs 2,3 -> outputs 1,2).
        input_output_aliases={2: 1, 3: 2},
        compiler_params=pltpu.CompilerParams(vmem_limit_bytes=32 * 1024 * 1024),
        cost_estimate=pl.CostEstimate(flops=flops,
                                      transcendentals=transcendentals,
                                      bytes_accessed=bytes_accessed),
    )(tok_p, padded["emb"], h_p, c_p,
      padded["w_cat"], padded["b"], padded["w_out"], padded["b_out"])

    logits = logits_p[:B, :output_dim]
    hidden = h_new_p[:B, :hidn_dim][None]
    cell = c_new_p[:B, :hidn_dim][None]
    return logits, hidden, cell


# ----------------------------------------------------------------------------
# Pure-JAX reference of the same math (for a correctness check).
# ----------------------------------------------------------------------------
def decoder_forward_ref(params, tokens, prev_hidden, prev_cell):
    H = params["w_hh"].shape[0]
    x = jnp.maximum(jnp.take(params["emb"], tokens, axis=0), 0.0)
    h0, c0 = prev_hidden[0], prev_cell[0]
    gates = x @ params["w_ih"] + h0 @ params["w_hh"] + params["b"]
    i_g = jax.nn.sigmoid(gates[:, 0 * H:1 * H])
    f_g = jax.nn.sigmoid(gates[:, 1 * H:2 * H])
    g_g = jnp.tanh(gates[:, 2 * H:3 * H])
    o_g = jax.nn.sigmoid(gates[:, 3 * H:4 * H])
    c = f_g * c0 + i_g * g_g
    h = o_g * jnp.tanh(c)
    logits = h @ params["w_out"] + params["b_out"]
    return logits, h[None], c[None]


# ----------------------------------------------------------------------------
# Deterministic parameter construction (logical, PyTorch-equivalent shapes).
# ----------------------------------------------------------------------------
def init_params(key, output_dim, emb_dim, hidn_dim):
    ks = jax.random.split(key, 6)
    s = 0.1
    return {
        "emb":   s * jax.random.normal(ks[0], (output_dim, emb_dim), jnp.float32),
        "w_ih":  s * jax.random.normal(ks[1], (emb_dim, 4 * hidn_dim), jnp.float32),
        "w_hh":  s * jax.random.normal(ks[2], (hidn_dim, 4 * hidn_dim), jnp.float32),
        "b":     s * jax.random.normal(ks[3], (4 * hidn_dim,), jnp.float32),
        "w_out": s * jax.random.normal(ks[4], (hidn_dim, output_dim), jnp.float32),
        "b_out": s * jax.random.normal(ks[5], (output_dim,), jnp.float32),
    }


if __name__ == "__main__":
    B = 2            # batch
    emb_dim = 16
    hidn_dim = 32
    output_dim = 24  # vocabulary size of the decoder

    key = jax.random.PRNGKey(0)
    kp, kt, kh, kc = jax.random.split(key, 4)
    params = init_params(kp, output_dim, emb_dim, hidn_dim)

    tokens = jax.random.randint(kt, (B,), 0, output_dim, dtype=jnp.int32)
    prev_hidden = 0.1 * jax.random.normal(kh, (1, B, hidn_dim), jnp.float32)
    prev_cell = 0.1 * jax.random.normal(kc, (1, B, hidn_dim), jnp.float32)

    padded = pad_decoder_params(params)
    logits, hidden, cell = decoder_forward(
        padded, tokens, prev_hidden, prev_cell,
        hidn_dim=hidn_dim, output_dim=output_dim)
    jax.block_until_ready((logits, hidden, cell))

    assert logits.shape == (B, output_dim)
    assert hidden.shape == (1, B, hidn_dim)
    assert cell.shape == (1, B, hidn_dim)

    ref_logits, ref_h, ref_c = decoder_forward_ref(params, tokens, prev_hidden, prev_cell)
    # Tolerance loosened vs the pure-f32 version: matmul weights are streamed as bf16
    # (f32 accumulation), which introduces ~1e-3-level rounding of the weights.
    assert jnp.allclose(logits, ref_logits, atol=1e-2, rtol=1e-2)
    assert jnp.allclose(hidden, ref_h, atol=1e-2, rtol=1e-2)
    assert jnp.allclose(cell, ref_c, atol=1e-2, rtol=1e-2)

    print("KERNEL_OK")
</pallas_src>

<mosaic_0001>
module attributes {stable_mosaic.version = 11 : i64} {
  func.func @_decoder_step_kernel(%arg0: memref<8x1xi32, #tpu.memory_space<vmem>>, %arg1: memref<128x128xf32, #tpu.memory_space<vmem>>, %arg2: memref<8x128xf32, #tpu.memory_space<vmem>>, %arg3: memref<8x128xf32, #tpu.memory_space<vmem>>, %arg4: memref<256x512xbf16, #tpu.memory_space<vmem>>, %arg5: memref<1x512xf32, #tpu.memory_space<vmem>>, %arg6: memref<128x128xbf16, #tpu.memory_space<vmem>>, %arg7: memref<1x128xf32, #tpu.memory_space<vmem>>, %arg8: memref<8x128xf32, #tpu.memory_space<vmem>>, %arg9: memref<8x128xf32, #tpu.memory_space<vmem>>, %arg10: memref<8x128xf32, #tpu.memory_space<vmem>>, %arg11: memref<8x256xf32, #tpu.memory_space<vmem>>) attributes {dimension_semantics = [], scalar_prefetch = 0 : i64, scratch_operands = 1 : i64, tpu.core_type = #tpu.core_type<tc>} {
    %0 = tpu.iota {dimensions = array<i32: 1>} : vector<8x128xi32>
    %c0 = arith.constant 0 : index
    %c0_0 = arith.constant 0 : index
    %1 = vector.load %arg0[%c0, %c0_0] : memref<8x1xi32, #tpu.memory_space<vmem>>, vector<8x1xi32>
    %2 = vector.broadcast %1 : vector<8x1xi32> to vector<8x128xi32>
    %3 = arith.cmpi eq, %0, %2 : vector<8x128xi32>
    %4 = arith.extui %3 : vector<8x128xi1> to vector<8x128xi32>
    %5 = arith.sitofp %4 : vector<8x128xi32> to vector<8x128xf32>
    %c0_1 = arith.constant 0 : index
    %c0_2 = arith.constant 0 : index
    %6 = vector.load %arg1[%c0_1, %c0_2] : memref<128x128xf32, #tpu.memory_space<vmem>>, vector<128x128xf32>
    %cst = arith.constant dense<0.000000e+00> : vector<8x128xf32>
    %7 = tpu.matmul %5, %6, %cst {dimension_numbers = #tpu.dot_dimension_numbers<[1], [0], [0], [1], [0, 0, 1, 1], [], []>} : vector<8x128xf32>, vector<128x128xf32>, vector<8x128xf32> -> vector<8x128xf32>
    %cst_3 = arith.constant 0.000000e+00 : f32
    %8 = vector.broadcast %cst_3 : f32 to vector<8x128xf32>
    %9 = arith.maximumf %7, %8 : vector<8x128xf32>
    %c0_4 = arith.constant 0 : index
    %c0_5 = arith.constant 0 : index
    %10 = vector.load %arg11[%c0_4, %c0_5] : memref<8x256xf32, #tpu.memory_space<vmem>>, vector<8x128xf32>
    tpu.vector_store %arg11[%c0_4, %c0_5], %9 {strides = array<i32>} : memref<8x256xf32, #tpu.memory_space<vmem>>, vector<8x128xf32>,
    %c0_6 = arith.constant 0 : index
    %c0_7 = arith.constant 0 : index
    %11 = vector.load %arg2[%c0_6, %c0_7] : memref<8x128xf32, #tpu.memory_space<vmem>>, vector<8x128xf32>
    %c0_8 = arith.constant 0 : index
    %c128 = arith.constant 128 : index
    %12 = vector.load %arg11[%c0_8, %c128] : memref<8x256xf32, #tpu.memory_space<vmem>>, vector<8x128xf32>
    tpu.vector_store %arg11[%c0_8, %c128], %11 {strides = array<i32>} : memref<8x256xf32, #tpu.memory_space<vmem>>, vector<8x128xf32>,
    %c0_9 = arith.constant 0 : index
    %c0_10 = arith.constant 0 : index
    %13 = vector.load %arg11[%c0_9, %c0_10] : memref<8x256xf32, #tpu.memory_space<vmem>>, vector<8x256xf32>
    %14 = arith.truncf %13 : vector<8x256xf32> to vector<8x256xbf16>
    %c0_11 = arith.constant 0 : index
    %c0_12 = arith.constant 0 : index
    %15 = vector.load %arg4[%c0_11, %c0_12] : memref<256x512xbf16, #tpu.memory_space<vmem>>, vector<256x512xbf16>
    %cst_13 = arith.constant dense<0.000000e+00> : vector<8x512xf32>
    %16 = tpu.matmul %14, %15, %cst_13 {dimension_numbers = #tpu.dot_dimension_numbers<[1], [0], [0], [1], [0, 0, 1, 1], [], []>} : vector<8x256xbf16>, vector<256x512xbf16>, vector<8x512xf32> -> vector<8x512xf32>
    %c0_14 = arith.constant 0 : index
    %c0_15 = arith.constant 0 : index
    %17 = vector.load %arg5[%c0_14, %c0_15] : memref<1x512xf32, #tpu.memory_space<vmem>>, vector<1x512xf32>
    %18 = vector.broadcast %17 : vector<1x512xf32> to vector<8x512xf32>
    %19 = arith.addf %16, %18 : vector<8x512xf32>
    %20 = vector.extract_strided_slice %19 {offsets = [0, 0], sizes = [8, 128], strides = [1, 1]} : vector<8x512xf32> to vector<8x128xf32>
    %21 = arith.negf %20 : vector<8x128xf32>
    %22 = math.exp %21 : vector<8x128xf32>
    %cst_16 = arith.constant 1.000000e+00 : f32
    %23 = vector.broadcast %cst_16 : f32 to vector<8x128xf32>
    %24 = arith.addf %23, %22 : vector<8x128xf32>
    %25 = arith.divf %23, %24 : vector<8x128xf32>
    %26 = vector.extract_strided_slice %19 {offsets = [0, 128], sizes = [8, 128], strides = [1, 1]} : vector<8x512xf32> to vector<8x128xf32>
    %27 = arith.negf %26 : vector<8x128xf32>
    %28 = math.exp %27 : vector<8x128xf32>
    %cst_17 = arith.constant 1.000000e+00 : f32
    %29 = vector.broadcast %cst_17 : f32 to vector<8x128xf32>
    %30 = arith.addf %29, %28 : vector<8x128xf32>
    %31 = arith.divf %29, %30 : vector<8x128xf32>
    %32 = vector.extract_strided_slice %19 {offsets = [0, 256], sizes = [8, 128], strides = [1, 1]} : vector<8x512xf32> to vector<8x128xf32>
    %33 = math.tanh %32 : vector<8x128xf32>
    %34 = vector.extract_strided_slice %19 {offsets = [0, 384], sizes = [8, 128], strides = [1, 1]} : vector<8x512xf32> to vector<8x128xf32>
    %35 = arith.negf %34 : vector<8x128xf32>
    %36 = math.exp %35 : vector<8x128xf32>
    %cst_18 = arith.constant 1.000000e+00 : f32
    %37 = vector.broadcast %cst_18 : f32 to vector<8x128xf32>
    %38 = arith.addf %37, %36 : vector<8x128xf32>
    %39 = arith.divf %37, %38 : vector<8x128xf32>
    %c0_19 = arith.constant 0 : index
    %c0_20 = arith.constant 0 : index
    %40 = vector.load %arg3[%c0_19, %c0_20] : memref<8x128xf32, #tpu.memory_space<vmem>>, vector<8x128xf32>
    %41 = arith.mulf %31, %40 : vector<8x128xf32>
    %42 = arith.mulf %25, %33 : vector<8x128xf32>
    %43 = arith.addf %41, %42 : vector<8x128xf32>
    %44 = math.tanh %43 : vector<8x128xf32>
    %45 = arith.mulf %39, %44 : vector<8x128xf32>
    %46 = arith.truncf %45 : vector<8x128xf32> to vector<8x128xbf16>
    %c0_21 = arith.constant 0 : index
    %c0_22 = arith.constant 0 : index
    %47 = vector.load %arg6[%c0_21, %c0_22] : memref<128x128xbf16, #tpu.memory_space<vmem>>, vector<128x128xbf16>
    %cst_23 = arith.constant dense<0.000000e+00> : vector<8x128xf32>
    %48 = tpu.matmul %46, %47, %cst_23 {dimension_numbers = #tpu.dot_dimension_numbers<[1], [0], [0], [1], [0, 0, 1, 1], [], []>} : vector<8x128xbf16>, vector<128x128xbf16>, vector<8x128xf32> -> vector<8x128xf32>
    %c0_24 = arith.constant 0 : index
    %c0_25 = arith.constant 0 : index
    %49 = vector.load %arg7[%c0_24, %c0_25] : memref<1x128xf32, #tpu.memory_space<vmem>>, vector<1x128xf32>
    %50 = vector.broadcast %49 : vector<1x128xf32> to vector<8x128xf32>
    %51 = arith.addf %48, %50 : vector<8x128xf32>
    %c0_26 = arith.constant 0 : index
    %c0_27 = arith.constant 0 : index
    %52 = vector.load %arg8[%c0_26, %c0_27] : memref<8x128xf32, #tpu.memory_space<vmem>>, vector<8x128xf32>
    tpu.vector_store %arg8[%c0_26, %c0_27], %51 {strides = array<i32>} : memref<8x128xf32, #tpu.memory_space<vmem>>, vector<8x128xf32>,
    %c0_28 = arith.constant 0 : index
    %c0_29 = arith.constant 0 : index
    %53 = vector.load %arg9[%c0_28, %c0_29] : memref<8x128xf32, #tpu.memory_space<vmem>>, vector<8x128xf32>
    tpu.vector_store %arg9[%c0_28, %c0_29], %45 {strides = array<i32>} : memref<8x128xf32, #tpu.memory_space<vmem>>, vector<8x128xf32>,
    %c0_30 = arith.constant 0 : index
    %c0_31 = arith.constant 0 : index
    %54 = vector.load %arg10[%c0_30, %c0_31] : memref<8x128xf32, #tpu.memory_space<vmem>>, vector<8x128xf32>
    tpu.vector_store %arg10[%c0_30, %c0_31], %43 {strides = array<i32>} : memref<8x128xf32, #tpu.memory_space<vmem>>, vector<8x128xf32>,
    return
  }
}

</mosaic_0001>

<bundles_post_ra>
// kernel: decoder_forward.1
= control target key start
LH: loop header
LB: loop body
LE: loop exit
PB: predicated region body
PF: predicated region fallthrough
CT: control target
= control target key end

     0   :  { %16 = vsyncpa [#allocation4], 0  ;;  %s1307_s0 = inlined_call_operand.vmem [shape: s32[8,1], index: 0, kind: input, shape index: {}]   ;;  %s1308_s1 = inlined_call_operand.hbm [shape: f32[128,128], index: 1, kind: input, shape index: {}]   ;;  %s1309_s2 = inlined_call_operand.vmem [shape: f32[8,128], index: 2, kind: input, shape index: {}, may-alias: {2,9}]   ;;  %s1310_s3 = inlined_call_operand.vmem [shape: f32[8,128], index: 3, kind: input, shape index: {}, may-alias: {3,10}]   ;;  %s1311_s4 = inlined_call_operand.hbm [shape: bf16[256,512], index: 4, kind: input, shape index: {}]   ;;  %s1312_s5 = inlined_call_operand.vmem [shape: f32[1,512], index: 5, kind: input, shape index: {}]   ;;  %s1313_s6 = inlined_call_operand.hbm [shape: bf16[128,128], index: 6, kind: input, shape index: {}]   ;;  %s1314_s7 = inlined_call_operand.vmem [shape: f32[1,128], index: 7, kind: input, shape index: {}]   ;;  %s1315_s8 = inlined_call_operand.vmem [shape: f32[8,128], index: 8, kind: output, shape index: {0}]   ;;  %s1316_s9 = inlined_call_operand.vmem [shape: f32[8,128], index: 9, kind: output, shape index: {1}, may-alias: {2,9}]   ;;  %s1317_s10 = inlined_call_operand.vmem [shape: f32[8,128], index: 10, kind: output, shape index: {2}, may-alias: {3,10}]  }
   0x1   :  { %17 = vsyncpa [#allocation6], 0  ;;  %s1176_s13 = smov [#allocation5]  }
   0x2   :  { %s41_s14 = sshll.u32 %s1176_s13, 4  ;;  %s42_s14 = int_to_ptr.vmem [resolvable:$true] %s41_s14 }
   0x3   :  { %s1120_s15 = scalar_lea.vmem %s42_s14, 8192  ;;  %p1125_p1 = scmp.lt.s32.totalorder %s42_s14, %s42_s14 }
   0x4   :  { %p1121_p0 = scmp.ne.s32.totalorder %s42_s14, %s1120_s15  ;;  %p1126_p2 = scmp.lt.s32.totalorder %s1120_s15, %s1120_s15 }
   0x6   :  { %p1127_p3 = por %p1126_p2, %p1125_p1 }
   0x8   :  { %p1128_p4 = pnand %p1127_p3, %p1121_p0 }
   0xa   :  { %1131 = shalt.err (!%p1128_p4)
}
   0xb   :  { %s1177_s16 = smov 256   ;;  %s1178_s17 = smov 16  }
   0xc   :  { %47 = dma.hbm_to_vmem [thread:$0]  %s1311_s4, 8192, %s42_s14, [#allocation6], %s1177_s16, %s1177_s16, %s1178_s17  }
   0xd   :  { %s1179_s20 = smov [#allocation3]  }
   0xe   :  { %s25_s21 = sshll.u32 %s1179_s20, 4  ;;  %s26_s21 = int_to_ptr.vmem [resolvable:$true] %s25_s21 }
   0xf   :  { %s1140_s22 = scalar_lea.vmem %s26_s21, 2048  ;;  %p1145_p6 = scmp.lt.s32.totalorder %s26_s21, %s26_s21 }
  0x10   :  { %p1141_p5 = scmp.ne.s32.totalorder %s26_s21, %s1140_s22  ;;  %p1146_p7 = scmp.lt.s32.totalorder %s1140_s22, %s1140_s22 }
  0x12   :  { %p1147_p8 = por %p1146_p7, %p1145_p6 }
  0x14   :  { %p1148_p9 = pnand %p1147_p8, %p1141_p5 }
  0x16   :  { %1151 = shalt.err (!%p1148_p9)
}
  0x17   :  { %s1180_s23 = smov 128   ;;  %s1181_s24 = smov 8  }
  0x18   :  { %31 = dma.hbm_to_vmem [thread:$0]  %s1308_s1, 2048, %s26_s21, [#allocation4], %s1180_s23, %s1180_s23, %s1181_s24  }
  0x19   :  { %s1182_s27 = smov [#allocation7]  }
  0x1a   :  { %s55_s28 = sshll.u32 %s1182_s27, 4  ;;  %s56_s28 = int_to_ptr.vmem [resolvable:$true] %s55_s28 }
  0x1b   :  { %s1160_s4 = scalar_lea.vmem %s56_s28, 1024  ;;  %p1165_p11 = scmp.lt.s32.totalorder %s56_s28, %s56_s28 }
  0x1c   :  { %p1161_p10 = scmp.ne.s32.totalorder %s56_s28, %s1160_s4  ;;  %p1166_p12 = scmp.lt.s32.totalorder %s1160_s4, %s1160_s4 }
  0x1e   :  { %p1167_p13 = por %p1166_p12, %p1165_p11 }
  0x20   :  { %p1168_p0 = pnand %p1167_p13, %p1161_p10 }
  0x22   :  { %1171 = shalt.err (!%p1168_p0)
}
  0x23   :  { %s1183_s29 = smov 64   ;;  %s1184_s30 = smov 4  }
  0x24   :  { %61 = dma.hbm_to_vmem [thread:$0]  %s1313_s6, 1024, %s56_s28, [#allocation6], %s1183_s29, %s1183_s29, %s1184_s30  }
  0x25   :  { %1172 = dma.done.wait [#allocation4], 2048  }
  0x26   :  { %1173 = vsyncadd [#allocation4], 4294965248 }
  0x27   :  { %1174 = dma.done.wait [#allocation6], 9216  }
  0x28   :  { %1175 = vsyncadd [#allocation6], 4294958080  ;;  %v1185_v0 = vmov 0   ;;  %v1186_v1 = vmov 0.0   ;;  %vm1187_vm0 = vmmov 0   ;;  %v76_v2 = vld [vmem:[%s1307_s0] sm:$0xff]  ;;  %v74_v50 = vlaneseq }
  0x29   :  { %991 = vset.pattern.permute.xlu0 %v1185_v0  ;;  %923 = vmatprep.subr.mxu0 %v1186_v1  ;;  %v98_v3 = vld [vmem:[#allocation3 + $0x78] sm:$0xff]  ;;  %v97_v4 = vld [vmem:[#allocation3 + $0x70] sm:$0xff]  ;;  %v96_v5 = vld [vmem:[#allocation3 + $0x68] sm:$0xff]  ;;  %v1188_v55 = vmov 1.0  }
  0x2a   :  { %955 = vmatprep.mubr.msk.f32.mxu0 %vm1187_vm0, %v1186_v1  ;;  %78 = vperm.xlu0 %991, %v76_v2   ;;  %v95_v6 = vld [vmem:[#allocation3 + $0x60] sm:$0xff]  ;;  %v94_v7 = vld [vmem:[#allocation3 + $0x58] sm:$0xff]  ;;  %v93_v9 = vld [vmem:[#allocation3 + $0x50] sm:$0xff]  ;;  %v75_v51 = vand.u32 127, %v74_v50 }
  0x2b   :  { %924 = vmatpush3.msra.mxu0 %v98_v3  ;;  %v992_v8 = vld [vmem:[#allocation5 + $0xe4] ss:$16 sps:$4 sm:$0xff]   ;;  %v997_v10 = vld [vmem:[#allocation5 + $0xe0] ss:$16 sps:$4 sm:$0xff]   ;;  %v92_v12 = vld [vmem:[#allocation3 + $0x48] sm:$0xff] }
  0x2c   :  { %925 = vmatprep.subr.mxu0 %v1186_v1  ;;  %583 = vmatprep.subr.bf16.mxu1 %v992_v8  ;;  %v998_v11 = vld [vmem:[#allocation5 + $0xc4] ss:$16 sps:$4 sm:$0xff]   ;;  %v1003_v13 = vld [vmem:[#allocation5 + $0xc0] ss:$16 sps:$4 sm:$0xff]   ;;  %v90_v16 = vld [vmem:[#allocation3 + $0x38] sm:$0xff] }
  0x2d   :  { %926 = vmatpush3.msra.mxu0 %v97_v4  ;;  %584 = vmatpush1.bf16.msra.mxu1 %v997_v10  ;;  %v1004_v14 = vld [vmem:[#allocation5 + $0xa4] ss:$16 sps:$4 sm:$0xff]   ;;  %v1009_v17 = vld [vmem:[#allocation5 + $0xa0] ss:$16 sps:$4 sm:$0xff]   ;;  %v88_v20 = vld [vmem:[#allocation3 + $0x28] sm:$0xff] }
  0x2e   :  { %927 = vmatprep.subr.mxu0 %v1186_v1  ;;  %585 = vmatprep.subr.bf16.mxu1 %v998_v11  ;;  %v91_v15 = vld [vmem:[#allocation3 + $0x40] sm:$0xff]  ;;  %v89_v19 = vld [vmem:[#allocation3 + $0x30] sm:$0xff]  ;;  %v86_v24 = vld [vmem:[#allocation3 + $0x18] sm:$0xff] }
  0x2f   :  { %928 = vmatpush3.msra.mxu0 %v96_v5  ;;  %v1010_v18 = vld [vmem:[#allocation5 + $0x84] ss:$16 sps:$4 sm:$0xff]   ;;  %v1015_v21 = vld [vmem:[#allocation5 + $0x80] ss:$16 sps:$4 sm:$0xff]   ;;  %v84_v28 = vld [vmem:[#allocation3 + $0x8] sm:$0xff] }
  0x30   :  { %929 = vmatprep.subr.mxu0 %v1186_v1  ;;  %v1016_v22 = vld [vmem:[#allocation5 + $0x64] ss:$16 sps:$4 sm:$0xff]   ;;  %v1021_v25 = vld [vmem:[#allocation5 + $0x60] ss:$16 sps:$4 sm:$0xff]   ;;  %v996_v32 = vld [vmem:[#allocation5 + $0xec] ss:$16 sps:$4 sm:$0xff]  }
  0x31   :  { %930 = vmatpush3.msra.mxu0 %v95_v6  ;;  %586 = vmatpush1.bf16.msra.mxu1 %v1003_v13  ;;  %v87_v23 = vld [vmem:[#allocation3 + $0x20] sm:$0xff]  ;;  %v85_v27 = vld [vmem:[#allocation3 + $0x10] sm:$0xff]  ;;  %v994_v52 = vld [vmem:[#allocation5 + $0xe8] ss:$16 sps:$4 sm:$0xff]  }
  0x32   :  { %931 = vmatprep.subr.mxu0 %v1186_v1  ;;  %587 = vmatprep.subr.bf16.mxu1 %v1004_v14  ;;  %v1022_v26 = vld [vmem:[#allocation5 + $0x44] ss:$16 sps:$4 sm:$0xff]   ;;  %v1027_v30 = vld [vmem:[#allocation5 + $0x40] ss:$16 sps:$4 sm:$0xff]   ;;  %v1002_v54 = vld [vmem:[#allocation5 + $0xcc] ss:$16 sps:$4 sm:$0xff]  }
  0x33   :  { %932 = vmatpush3.msra.mxu0 %v94_v7  ;;  %v83_v29 = vld [vmem:[#allocation3] sm:$0xff]  ;;  %v1000_v56 = vld [vmem:[#allocation5 + $0xc8] ss:$16 sps:$4 sm:$0xff]   ;;  %v1008_v57 = vld [vmem:[#allocation5 + $0xac] ss:$16 sps:$4 sm:$0xff]  }
  0x34   :  { %933 = vmatprep.subr.mxu0 %v1186_v1  ;;  %v1028_v31 = vld [vmem:[#allocation5 + $0x24] ss:$16 sps:$4 sm:$0xff]   ;;  %v1033_v33 = vld [vmem:[#allocation5 + $0x20] ss:$16 sps:$4 sm:$0xff]   ;;  %v1006_v58 = vld [vmem:[#allocation5 + $0xa8] ss:$16 sps:$4 sm:$0xff]  }
  0x35   :  { %934 = vmatpush3.msra.mxu0 %v93_v9  ;;  %588 = vmatpush1.bf16.msra.mxu1 %v1009_v17  ;;  %v1034_v34 = vld [vmem:[#allocation5 + $0x4] ss:$16 sps:$4 sm:$0xff]   ;;  %v1039_v35 = vld [vmem:[#allocation5] ss:$16 sps:$4 sm:$0xff]   ;;  %v1014_v59 = vld [vmem:[#allocation5 + $0x8c] ss:$16 sps:$4 sm:$0xff]  }
  0x36   :  { %935 = vmatprep.subr.mxu0 %v1186_v1  ;;  %589 = vmatprep.subr.bf16.mxu1 %v1010_v18  ;;  %v1040_v36 = vld [vmem:[#allocation5 + $0x1e4] ss:$16 sps:$4 sm:$0xff]   ;;  %v1045_v37 = vld [vmem:[#allocation5 + $0x1e0] ss:$16 sps:$4 sm:$0xff]   ;;  %v1012_v60 = vld [vmem:[#allocation5 + $0x88] ss:$16 sps:$4 sm:$0xff]  }
  0x37   :  { %936 = vmatpush3.msra.mxu0 %v92_v12  ;;  %v1046_v38 = vld [vmem:[#allocation5 + $0x1c4] ss:$16 sps:$4 sm:$0xff]   ;;  %v1051_v39 = vld [vmem:[#allocation5 + $0x1c0] ss:$16 sps:$4 sm:$0xff]   ;;  %v1020_v61 = vld [vmem:[#allocation5 + $0x6c] ss:$16 sps:$4 sm:$0xff]  }
  0x38   :  { %937 = vmatprep.subr.mxu0 %v1186_v1  ;;  %v1052_v40 = vld [vmem:[#allocation5 + $0x1a4] ss:$16 sps:$4 sm:$0xff]   ;;  %v1057_v41 = vld [vmem:[#allocation5 + $0x1a0] ss:$16 sps:$4 sm:$0xff]   ;;  %v1018_v62 = vld [vmem:[#allocation5 + $0x68] ss:$16 sps:$4 sm:$0xff]  }
  0x39   :  { %938 = vmatpush3.msra.mxu0 %v91_v15  ;;  %590 = vmatpush1.bf16.msra.mxu1 %v1015_v21  ;;  %v1058_v42 = vld [vmem:[#allocation5 + $0x184] ss:$16 sps:$4 sm:$0xff]   ;;  %v1063_v43 = vld [vmem:[#allocation5 + $0x180] ss:$16 sps:$4 sm:$0xff]   ;;  %v1026_v63 = vld [vmem:[#allocation5 + $0x4c] ss:$16 sps:$4 sm:$0xff]  }
  0x3a   :  { %939 = vmatprep.subr.mxu0 %v1186_v1  ;;  %591 = vmatprep.subr.bf16.mxu1 %v1016_v22  ;;  %v1064_v44 = vld [vmem:[#allocation5 + $0x164] ss:$16 sps:$4 sm:$0xff]   ;;  %v1069_v45 = vld [vmem:[#allocation5 + $0x160] ss:$16 sps:$4 sm:$0xff]   ;;  %v1024_v0 = vld [vmem:[#allocation5 + $0x48] ss:$16 sps:$4 sm:$0xff]  }
  0x3b   :  { %940 = vmatpush3.msra.mxu0 %v90_v16  ;;  %v1070_v46 = vld [vmem:[#allocation5 + $0x144] ss:$16 sps:$4 sm:$0xff]   ;;  %v1075_v47 = vld [vmem:[#allocation5 + $0x140] ss:$16 sps:$4 sm:$0xff]   ;;  %v1032_v2 = vld [vmem:[#allocation5 + $0x2c] ss:$16 sps:$4 sm:$0xff]  }
  0x3c   :  { %941 = vmatprep.subr.mxu0 %v1186_v1  ;;  %v1076_v48 = vld [vmem:[#allocation5 + $0x124] ss:$16 sps:$4 sm:$0xff]   ;;  %v1081_v49 = vld [vmem:[#allocation5 + $0x120] ss:$16 sps:$4 sm:$0xff]   ;;  %v1030_v3 = vld [vmem:[#allocation5 + $0x28] ss:$16 sps:$4 sm:$0xff]  }
  0x3d   :  { %942 = vmatpush3.msra.mxu0 %v89_v19  ;;  %592 = vmatpush1.bf16.msra.mxu1 %v1021_v25  ;;  %v1038_v4 = vld [vmem:[#allocation5 + $0xc] ss:$16 sps:$4 sm:$0xff]   ;;  %v1036_v5 = vld [vmem:[#allocation5 + $0x8] ss:$16 sps:$4 sm:$0xff]  }
  0x3e   :  { %943 = vmatprep.subr.mxu0 %v1186_v1  ;;  %593 = vmatprep.subr.bf16.mxu1 %v1022_v26  ;;  %v1044_v6 = vld [vmem:[#allocation5 + $0x1ec] ss:$16 sps:$4 sm:$0xff]   ;;  %v1042_v7 = vld [vmem:[#allocation5 + $0x1e8] ss:$16 sps:$4 sm:$0xff]  }
  0x3f   :  { %944 = vmatpush3.msra.mxu0 %v88_v20  ;;  %v1050_v8 = vld [vmem:[#allocation5 + $0x1cc] ss:$16 sps:$4 sm:$0xff]   ;;  %v1048_v9 = vld [vmem:[#allocation5 + $0x1c8] ss:$16 sps:$4 sm:$0xff]   ;;  %v1082_v20 = vld [vmem:[#allocation5 + $0x104] ss:$16 sps:$4 sm:$0xff]  }
  0x40   :  { %945 = vmatprep.subr.mxu0 %v1186_v1  ;;  %v1056_v10 = vld [vmem:[#allocation5 + $0x1ac] ss:$16 sps:$4 sm:$0xff]   ;;  %v1054_v11 = vld [vmem:[#allocation5 + $0x1a8] ss:$16 sps:$4 sm:$0xff]  }
  0x41   :  { %946 = vmatpush3.msra.mxu0 %v87_v23  ;;  %594 = vmatpush1.bf16.msra.mxu1 %v1027_v30  ;;  %v1062_v12 = vld [vmem:[#allocation5 + $0x18c] ss:$16 sps:$4 sm:$0xff]   ;;  %v1060_v13 = vld [vmem:[#allocation5 + $0x188] ss:$16 sps:$4 sm:$0xff]   ;;  %v1087_v23 = vld [vmem:[#allocation5 + $0x100] ss:$16 sps:$4 sm:$0xff]  }
  0x42   :  { %947 = vmatprep.subr.mxu0 %v1186_v1  ;;  %595 = vmatprep.subr.bf16.mxu1 %v1028_v31  ;;  %v1068_v14 = vld [vmem:[#allocation5 + $0x16c] ss:$16 sps:$4 sm:$0xff]   ;;  %v1066_v15 = vld [vmem:[#allocation5 + $0x168] ss:$16 sps:$4 sm:$0xff]   ;;  %v1089_v31 = vld [vmem:[#allocation7 + $0x30] sm:$0xff]  }
  0x43   :  { %948 = vmatpush3.msra.mxu0 %v86_v24  ;;  %v1074_v16 = vld [vmem:[#allocation5 + $0x14c] ss:$16 sps:$4 sm:$0xff]   ;;  %v1072_v17 = vld [vmem:[#allocation5 + $0x148] ss:$16 sps:$4 sm:$0xff]   ;;  %v171_v24 = vld [vmem:[%s1309_s2] sm:$0xff] }
  0x44   :  { %949 = vmatprep.subr.mxu0 %v1186_v1  ;;  %v1080_v18 = vld [vmem:[#allocation5 + $0x12c] ss:$16 sps:$4 sm:$0xff]   ;;  %v1078_v19 = vld [vmem:[#allocation5 + $0x128] ss:$16 sps:$4 sm:$0xff]   ;;  %v176_v25 = vpack.c.bf16 %v171_v24, %v171_v24 }
  0x45   :  { %950 = vmatpush3.msra.mxu0 %v85_v27  ;;  %596 = vmatpush1.bf16.msra.mxu1 %v1033_v33  ;;  %v1086_v21 = vld [vmem:[#allocation5 + $0x10c] ss:$16 sps:$4 sm:$0xff]   ;;  %v1084_v22 = vld [vmem:[#allocation5 + $0x108] ss:$16 sps:$4 sm:$0xff]   ;;  %v1091_v33 = vld [vmem:[#allocation7 + $0x20] sm:$0xff]  }
  0x46   :  { %951 = vmatprep.subr.mxu0 %v1186_v1  ;;  %597 = vmatprep.subr.bf16.mxu1 %v1034_v34  ;;  %v1088_v30 = vld [vmem:[#allocation7 + $0x38] sm:$0xff]  }
  0x47   :  { %952 = vmatpush3.msra.mxu0 %v84_v28  ;;  %615 = vmatprep.mubr.bf16.mxu1 %v176_v25  ;;  %v1092_v34 = vld [vmem:[#allocation7 + $0x18] sm:$0xff]  }
  0x48   :  { %953 = vmatprep.subr.mxu0 %v1186_v1 }
  0x49   :  { %954 = vmatpush3.msra.mxu0 %v83_v29  ;;  %598 = vmatpush1.bf16.msra.mxu1 %v1039_v35  ;;  %v1093_v35 = vld [vmem:[#allocation7 + $0x10] sm:$0xff]  }
  0x4a   :  { %624 = vmatprep.subr.bf16.mxu0 %v996_v32  ;;  %599 = vmatprep.subr.bf16.mxu1 %v1040_v36  ;;  %v1090_v32 = vld [vmem:[#allocation7 + $0x28] sm:$0xff]  }
  0x4b   :  { %v1094_v36 = vld [vmem:[#allocation7 + $0x8] sm:$0xff]  }
  0x4d   :  { %600 = vmatpush2.bf16.msra.mxu1 %v1045_v37  ;;  %v1095_v37 = vld [vmem:[#allocation7] sm:$0xff]  }
  0x4e   :  { %601 = vmatprep.subr.bf16.mxu1 %v1046_v38  ;;  %v244_v38 = vshrl.u32 %v74_v50, 7 }
  0x51   :  { %602 = vmatpush2.bf16.msra.mxu1 %v1051_v39  ;;  %v245_v39 = vsub.s32 0, %v244_v38 }
  0x52   :  { %603 = vmatprep.subr.bf16.mxu1 %v1052_v40  ;;  %v241_v40 = vld [vmem:[%s1312_s5] sm:$0xf] }
  0x55   :  { %604 = vmatpush2.bf16.msra.mxu1 %v1057_v41  ;;  %v249_v41 = vsub.s32 1, %v244_v38 }
  0x56   :  { %605 = vmatprep.subr.bf16.mxu1 %v1058_v42  ;;  %v246_v42 = vrot.slane %v241_v40, %v245_v39 }
  0x59   :  { %606 = vmatpush2.bf16.msra.mxu1 %v1063_v43  ;;  %v250_v43 = vrot.slane %v241_v40, %v249_v41 }
  0x5a   :  { %607 = vmatprep.subr.bf16.mxu1 %v1064_v44 }
  0x5d   :  { %608 = vmatpush2.bf16.msra.mxu1 %v1069_v45 }
  0x5e   :  { %609 = vmatprep.subr.bf16.mxu1 %v1070_v46 }
  0x61   :  { %610 = vmatpush2.bf16.msra.mxu1 %v1075_v47 }
  0x62   :  { %611 = vmatprep.subr.bf16.mxu1 %v1076_v48 }
  0x65   :  { %612 = vmatpush2.bf16.msra.mxu1 %v1081_v49 }
  0x66   :  { %613 = vmatprep.subr.bf16.mxu1 %v1082_v20 }
  0x69   :  { %614 = vmatpush2.bf16.msra.mxu1 %v1087_v23 }
  0x6a   :  { %958 = vmatprep.subr.bf16.mxu1 %v1186_v1 }
  0xa5   :  { %v79_v53 = vpop.permute.xlu0 %78 }
  0xa6   :  { %vm80_vm1 = vcmp.eq.s32.totalorder %v75_v51, %v79_v53 }
  0xa7   :  { %956 = vmatmul.mubr.msk.f32.vlgmr.msra.gmra.mxu0 %vm80_vm1, %v1188_v55 }
  0xa8   :  { %625 = vmatpush1.bf16.msra.mxu0 %v994_v52  ;;  %656 = vmatprep.mubr.bf16.mxu0 %v176_v25  ;;  %v257_v52 = vsub.s32 3, %v244_v38 }
  0xa9   :  { %626 = vmatprep.subr.bf16.mxu0 %v1002_v54 }
  0xac   :  { %627 = vmatpush1.bf16.msra.mxu0 %v1000_v56  ;;  %v258_v56 = vrot.slane %v241_v40, %v257_v52 }
  0xad   :  { %628 = vmatprep.subr.bf16.mxu0 %v1008_v57  ;;  %v253_v57 = vsub.s32 2, %v244_v38 }
  0xb0   :  { %629 = vmatpush1.bf16.msra.mxu0 %v1006_v58 }
  0xb1   :  { %630 = vmatprep.subr.bf16.mxu0 %v1014_v59  ;;  %v254_v59 = vrot.slane %v241_v40, %v253_v57 }
  0xb4   :  { %631 = vmatpush1.bf16.msra.mxu0 %v1012_v60 }
  0xb5   :  { %632 = vmatprep.subr.bf16.mxu0 %v1020_v61 }
  0xb8   :  { %633 = vmatpush1.bf16.msra.mxu0 %v1018_v62 }
  0xb9   :  { %634 = vmatprep.subr.bf16.mxu0 %v1026_v63 }
  0xbc   :  { %635 = vmatpush1.bf16.msra.mxu0 %v1024_v0 }
  0xbd   :  { %636 = vmatprep.subr.bf16.mxu0 %v1032_v2 }
  0xc0   :  { %637 = vmatpush1.bf16.msra.mxu0 %v1030_v3 }
  0xc1   :  { %638 = vmatprep.subr.bf16.mxu0 %v1038_v4 }
  0xc4   :  { %639 = vmatpush1.bf16.msra.mxu0 %v1036_v5  ;;  %v684_v5 = vld [vmem:[%s1310_s3] sm:$0xff] }
  0xc5   :  { %640 = vmatprep.subr.bf16.mxu0 %v1044_v6 }
  0xc8   :  { %641 = vmatpush2.bf16.msra.mxu0 %v1042_v7 }
  0xc9   :  { %642 = vmatprep.subr.bf16.mxu0 %v1050_v8 }
  0xcc   :  { %643 = vmatpush2.bf16.msra.mxu0 %v1048_v9 }
  0xcd   :  { %644 = vmatprep.subr.bf16.mxu0 %v1056_v10 }
  0xd0   :  { %645 = vmatpush2.bf16.msra.mxu0 %v1054_v11 }
  0xd1   :  { %646 = vmatprep.subr.bf16.mxu0 %v1062_v12 }
  0xd4   :  { %647 = vmatpush2.bf16.msra.mxu0 %v1060_v13 }
  0xd5   :  { %648 = vmatprep.subr.bf16.mxu0 %v1068_v14 }
  0xd8   :  { %649 = vmatpush2.bf16.msra.mxu0 %v1066_v15 }
  0xd9   :  { %650 = vmatprep.subr.bf16.mxu0 %v1074_v16  ;;  %v888_v16 = vld [vmem:[%s1314_s7] ss:$0 sm:$0xff] }
  0xdc   :  { %651 = vmatpush2.bf16.msra.mxu0 %v1072_v17 }
  0xdd   :  { %652 = vmatprep.subr.bf16.mxu0 %v1080_v18 }
  0xe0   :  { %653 = vmatpush2.bf16.msra.mxu0 %v1078_v19 }
  0xe1   :  { %654 = vmatprep.subr.bf16.mxu0 %v1086_v21 }
  0xe4   :  { %655 = vmatpush2.bf16.msra.mxu0 %v1084_v22 }
 0x167   :  { %v165_v26 = vpop.f32.mrf.mxu0 }
 0x168   :  { %v169_v27 = vmax.f32 %v165_v26, 0.0 }
 0x169   :  { %v957_v28 = vpop.f32.mrf.mxu0 }
 0x16a   :  { %v175_v29 = vpack.c.bf16 %v169_v27, %v169_v27 }
 0x16c   :  { %616 = vmatmul.mubr.bf16.vlgmr.msra.gmra.mxu1 %v175_v29  ;;  %657 = vmatmul.mubr.bf16.vlgmr.msra.gmra.mxu0 %v175_v29 }
 0x16d   :  { %974 = vmatprep.mubr.msk.bf16.mxu1 %vm1187_vm0, %v1186_v1  ;;  %959 = vmatpush3.bf16.msra.mxu1 %v1088_v30 }
 0x16e   :  { %960 = vmatprep.subr.bf16.mxu1 %v1186_v1 }
 0x171   :  { %961 = vmatpush3.bf16.msra.mxu1 %v1089_v31 }
 0x172   :  { %962 = vmatprep.subr.bf16.mxu1 %v1186_v1 }
 0x175   :  { %963 = vmatpush3.bf16.msra.mxu1 %v1090_v32 }
 0x176   :  { %964 = vmatprep.subr.bf16.mxu1 %v1186_v1 }
 0x179   :  { %965 = vmatpush3.bf16.msra.mxu1 %v1091_v33 }
 0x17a   :  { %966 = vmatprep.subr.bf16.mxu1 %v1186_v1 }
 0x17d   :  { %967 = vmatpush3.bf16.msra.mxu1 %v1092_v34 }
 0x17e   :  { %968 = vmatprep.subr.bf16.mxu1 %v1186_v1 }
 0x181   :  { %969 = vmatpush3.bf16.msra.mxu1 %v1093_v35 }
 0x182   :  { %970 = vmatprep.subr.bf16.mxu1 %v1186_v1 }
 0x185   :  { %971 = vmatpush3.bf16.msra.mxu1 %v1094_v36 }
 0x186   :  { %972 = vmatprep.subr.bf16.mxu1 %v1186_v1 }
 0x189   :  { %973 = vmatpush3.bf16.msra.mxu1 %v1095_v37 }
 0x22c   :  { %v617_v44 = vpop.f32.mrf.mxu1  ;;  %v658_v45 = vpop.f32.mrf.mxu0 }
 0x22d   :  { %v618_v46 = vadd.f32 %v617_v44, %v246_v42  ;;  %v659_v62 = vadd.f32 %v658_v45, %v254_v59 }
 0x22e   :  { %v619_v47 = vpop.f32.mrf.mxu1  ;;  %v660_v48 = vpop.f32.mrf.mxu0 }
 0x22f   :  { %v885_v49 = vmul.f32 -1.442695, %v618_v46  ;;  %v620_v51 = vadd.f32 %v619_v47, %v250_v43  ;;  %v661_v58 = vadd.f32 %v660_v48, %v258_v56 }
 0x230   :  { %v621_v1 = vpop.f32.mrf.mxu1  ;;  %v662_v53 = vpop.f32.mrf.mxu0 }
 0x231   :  { %1096 = vpow2.f32 %v885_v49  ;;  %v886_v50 = vmul.f32 -1.442695, %v620_v51  ;;  %v887_v60 = vmul.f32 -1.442695, %v661_v58 }
 0x232   :  { %v622_v54 = vpop.f32.mrf.mxu1  ;;  %v663_v55 = vpop.f32.mrf.mxu0 }
 0x233   :  { %1098 = vpow2.f32 %v886_v50 }
 0x234   :  { %1100 = vpow2.f32 %v887_v60 }
 0x23e   :  { %v1097_v61 = vpop.eup %1096 }
 0x23f   :  { %v668_v63 = vadd.f32 1.0, %v1097_v61 }
 0x240   :  { %v1099_v0 = vpop.eup %1098 }
 0x241   :  { %1102 = vrcp.f32 %v668_v63  ;;  %v674_v2 = vadd.f32 1.0, %v1099_v0  ;;  %v1101_v3 = vpop.eup %1100 }
 0x242   :  { %1104 = vtanh.f32 %v659_v62  ;;  %v681_v8 = vadd.f32 1.0, %v1101_v3 }
 0x243   :  { %1106 = vrcp.f32 %v674_v2 }
 0x244   :  { %1108 = vrcp.f32 %v681_v8 }
 0x24e   :  { %v1103_v4 = vpop.eup %1102 }
 0x24f   :  { %v1105_v6 = vpop.eup %1104 }
 0x250   :  { %v1107_v7 = vpop.eup %1106  ;;  %v686_v9 = vmul.f32 %v1105_v6, %v1103_v4 }
 0x251   :  { %v685_v10 = vmul.f32 %v1107_v7, %v684_v5  ;;  %v1109_v12 = vpop.eup %1108 }
 0x253   :  { %v687_v11 = vadd.f32 %v686_v9, %v685_v10 }
 0x255   :  { %804 = vst [vmem:[%s1317_s10] sm:$0xff] %v687_v11  ;;  %1110 = vtanh.f32 %v687_v11 }
 0x262   :  { %v1111_v13 = vpop.eup %1110 }
 0x263   :  { %v689_v14 = vmul.f32 %v1111_v13, %v1109_v12 }
 0x265   :  { %v690_v15 = vpack.c.bf16 %v689_v14, %v689_v14  ;;  %803 = vst [vmem:[%s1316_s9] sm:$0xff] %v689_v14 }
 0x267   :  { %975 = vmatmul.mubr.bf16.vlgmr.msra.gmra.mxu1 %v690_v15 }
 0x327   :  { %v796_v17 = vpop.f32.mrf.mxu1 }
 0x328   :  { %v797_v18 = vadd.f32 %v888_v16, %v796_v17 }
 0x329   :  { %v976_v19 = vpop.f32.mrf.mxu1 }
 0x32a   :  { %802 = vst [vmem:[%s1315_s8] sm:$0xff] %v797_v18 }
 0x32b   :  { %v799_v20 = vpop.f32.mrf.mxu1 }
 0x32d   :  { %v977_v21 = vpop.f32.mrf.mxu1 }
 0x32e   :  { %817 = vsyncpa [#allocation4], 1 }
 0x32f   :  { %818 = vsyncpa [#allocation6], 1 }

</bundles_post_ra>
